<compile_context>
chip_gen: v7x
topology: tpu7x:2x2x1
jax: 0.10.0
libtpu: 0.0.40
codegen_flags: <defaults>
</compile_context>

<pallas_src>
import jax
import jax.numpy as jnp
from jax.experimental import pallas as pl
from jax.experimental.pallas import tpu as pltpu  # noqa: F401

# ---------------- configuration (module hyper-parameters) ----------------
B = 2            # batch
N = 8            # sequence length (tokens)
D = 32           # embedding dim
HEADS = 4        # attention heads
HD = D // HEADS  # per-head dim
FF = 64          # feed-forward hidden dim
EPS = 1e-6       # LayerNorm eps
ATT_SCALE = "per_head"   # => scale = D // HEADS
GELU_TYPE = "quick"      # quick_gelu: x * sigmoid(1.702 * x)
SCALE = (D // HEADS) if ATT_SCALE == "per_head" else D
BN = B * N       # fused token count


# ---------------------------- Pallas kernel ------------------------------
def block_kernel(x_ref,
                 ln1g_ref, ln1b_ref,
                 wqkv_ref, bqkv_ref,
                 wo_ref, bo_ref,
                 ln2g_ref, ln2b_ref,
                 w1_ref, b1_ref, w2_ref, b2_ref,
                 o_ref):
    x = x_ref[...]                                   # (B*N, D) fused token slab

    # ---- LayerNorm 1 (biased variance, like torch.nn.LayerNorm) ----
    mu = jnp.mean(x, axis=-1, keepdims=True)
    var = jnp.mean((x - mu) ** 2, axis=-1, keepdims=True)
    xn = (x - mu) * jax.lax.rsqrt(var + EPS) * ln1g_ref[...] + ln1b_ref[...]

    # ---- fused QKV projection over all B*N tokens (single MXU push) ----
    qkv = jnp.dot(xn, wqkv_ref[...],
                  preferred_element_type=jnp.float32) + bqkv_ref[...]   # (BN, 3D)
    q3 = qkv[:, 0 * D:1 * D].reshape(B, N, D)        # leading-dim reshape (cheap)
    k3 = qkv[:, 1 * D:2 * D].reshape(B, N, D)
    v3 = qkv[:, 2 * D:3 * D].reshape(B, N, D)

    # ---- multi-headed self-attention, batched over B per head ----
    inv_sqrt_scale = 1.0 / (float(SCALE) ** 0.5)
    head_outs = []
    for hh in range(HEADS):
        lo = hh * HD
        qh = q3[:, :, lo:lo + HD]                    # (B, N, HD)
        kh = k3[:, :, lo:lo + HD]
        vh = v3[:, :, lo:lo + HD]
        s = jnp.einsum('bnd,bmd->bnm', qh, kh,
                       preferred_element_type=jnp.float32) * inv_sqrt_scale
        s = s - jnp.max(s, axis=-1, keepdims=True)
        p = jnp.exp(s)
        # one reciprocal per row + multiply (exact; keeps atol 1e-4 vs reference)
        p = p * pl.reciprocal(jnp.sum(p, axis=-1, keepdims=True), approx=False)
        head_outs.append(jnp.einsum('bnm,bmd->bnd', p, vh,
                                    preferred_element_type=jnp.float32))
    h = jnp.concatenate(head_outs, axis=-1).reshape(BN, D)   # merge heads (lane concat)

    # ---- output projection + residual ----
    h = jnp.dot(h, wo_ref[...], preferred_element_type=jnp.float32) + bo_ref[...]
    x1 = x + h

    # ---- LayerNorm 2 ----
    mu2 = jnp.mean(x1, axis=-1, keepdims=True)
    var2 = jnp.mean((x1 - mu2) ** 2, axis=-1, keepdims=True)
    xn2 = (x1 - mu2) * jax.lax.rsqrt(var2 + EPS) * ln2g_ref[...] + ln2b_ref[...]

    # ---- position-wise feed-forward (quick gelu) ----
    f = jnp.dot(xn2, w1_ref[...], preferred_element_type=jnp.float32) + b1_ref[...]
    f = f * jax.nn.sigmoid(1.702 * f)                # quick_gelu
    f = jnp.dot(f, w2_ref[...], preferred_element_type=jnp.float32) + b2_ref[...]

    o_ref[...] = x1 + f


# ------------------------------ wrapper -----------------------------------
def vit_block(x, params):
    (ln1g, ln1b, wq, bq, wk, bk, wv, bv, wo, bo,
     ln2g, ln2b, w1, b1, w2, b2) = params

    x2 = x.reshape(BN, D)                            # fuse batch into matmul M-dim

    # fuse QKV weights / biases in the wrapper (one-time, outside the kernel)
    wqkv = jnp.concatenate([wq, wk, wv], axis=1)     # (D, 3D)
    bqkv = jnp.concatenate([bq, bk, bv], axis=1)     # (1, 3D)

    def full(shape):
        return pl.BlockSpec(shape, lambda i, _s=shape: (0,) * len(_s))

    in_specs = [
        full((BN, D)),                               # x (fused)
        full((1, D)), full((1, D)),                  # ln1 gamma/beta
        full((D, 3 * D)), full((1, 3 * D)),          # fused qkv weight / bias
        full((D, D)), full((1, D)),                  # wo, bo
        full((1, D)), full((1, D)),                  # ln2 gamma/beta
        full((D, FF)), full((1, FF)),                # fc1
        full((FF, D)), full((1, D)),                 # fc2
    ]

    out = pl.pallas_call(
        block_kernel,
        out_shape=jax.ShapeDtypeStruct((BN, D), jnp.float32),
        grid=(1,),                                   # single program: whole problem fused
        in_specs=in_specs,
        out_specs=full((BN, D)),
    )(x2, ln1g, ln1b, wqkv, bqkv, wo, bo,
      ln2g, ln2b, w1, b1, w2, b2)

    return out.reshape(B, N, D)


# --------------------------- pure-JAX reference ----------------------------
def vit_block_ref(x, params):
    (ln1g, ln1b, wq, bq, wk, bk, wv, bv, wo, bo,
     ln2g, ln2b, w1, b1, w2, b2) = params

    def ln(t, g, bvec):
        mu = jnp.mean(t, axis=-1, keepdims=True)
        var = jnp.mean((t - mu) ** 2, axis=-1, keepdims=True)
        return (t - mu) / jnp.sqrt(var + EPS) * g + bvec

    xn = ln(x, ln1g, ln1b)
    q = xn @ wq + bq
    k = xn @ wk + bk
    v = xn @ wv + bv
    split = lambda t: t.reshape(B, N, HEADS, HD).transpose(0, 2, 1, 3)
    q, k, v = split(q), split(k), split(v)
    scores = (q @ k.transpose(0, 1, 3, 2)) / (float(SCALE) ** 0.5)
    scores = jax.nn.softmax(scores, axis=-1)
    h = (scores @ v).transpose(0, 2, 1, 3).reshape(B, N, D)
    h = h @ wo + bo
    x = x + h
    xn2 = ln(x, ln2g, ln2b)
    f = xn2 @ w1 + b1
    f = f * jax.nn.sigmoid(1.702 * f)
    f = f @ w2 + b2
    return x + f


# ---------------------------------- main -----------------------------------
if __name__ == "__main__":
    key = jax.random.PRNGKey(0)
    keys = jax.random.split(key, 9)

    x = jax.random.normal(keys[0], (B, N, D), dtype=jnp.float32)

    # deterministic synthetic parameters (weights stored as (in, out), biases as (1, out))
    sc = 0.05
    ln1g = jnp.ones((1, D), jnp.float32)
    ln1b = jnp.zeros((1, D), jnp.float32)
    wq = sc * jax.random.normal(keys[1], (D, D), jnp.float32)
    bq = sc * jax.random.normal(keys[2], (1, D), jnp.float32)
    wk = sc * jax.random.normal(keys[3], (D, D), jnp.float32)
    bk = jnp.zeros((1, D), jnp.float32)
    wv = sc * jax.random.normal(keys[4], (D, D), jnp.float32)
    bv = jnp.zeros((1, D), jnp.float32)
    wo = sc * jax.random.normal(keys[5], (D, D), jnp.float32)
    bo = jnp.zeros((1, D), jnp.float32)
    ln2g = jnp.ones((1, D), jnp.float32)
    ln2b = jnp.zeros((1, D), jnp.float32)
    w1 = sc * jax.random.normal(keys[6], (D, FF), jnp.float32)
    b1 = sc * jax.random.normal(keys[7], (1, FF), jnp.float32)
    w2 = sc * jax.random.normal(keys[8], (FF, D), jnp.float32)
    b2 = jnp.zeros((1, D), jnp.float32)

    params = (ln1g, ln1b, wq, bq, wk, bk, wv, bv, wo, bo,
              ln2g, ln2b, w1, b1, w2, b2)

    out = jax.block_until_ready(vit_block(x, params))
    ref = jax.block_until_ready(vit_block_ref(x, params))

    assert out.shape == (B, N, D)
    assert jnp.allclose(out, ref, atol=1e-4, rtol=1e-4), \
        f"max abs err {jnp.max(jnp.abs(out - ref))}"
    print("KERNEL_OK")
</pallas_src>

<mosaic_0001>
module attributes {stable_mosaic.version = 11 : i64} {
  func.func @block_kernel(%arg0: i32, %arg1: memref<16x32xf32, #tpu.memory_space<vmem>>, %arg2: memref<1x32xf32, #tpu.memory_space<vmem>>, %arg3: memref<1x32xf32, #tpu.memory_space<vmem>>, %arg4: memref<32x96xf32, #tpu.memory_space<vmem>>, %arg5: memref<1x96xf32, #tpu.memory_space<vmem>>, %arg6: memref<32x32xf32, #tpu.memory_space<vmem>>, %arg7: memref<1x32xf32, #tpu.memory_space<vmem>>, %arg8: memref<1x32xf32, #tpu.memory_space<vmem>>, %arg9: memref<1x32xf32, #tpu.memory_space<vmem>>, %arg10: memref<32x64xf32, #tpu.memory_space<vmem>>, %arg11: memref<1x64xf32, #tpu.memory_space<vmem>>, %arg12: memref<64x32xf32, #tpu.memory_space<vmem>>, %arg13: memref<1x32xf32, #tpu.memory_space<vmem>>, %arg14: memref<16x32xf32, #tpu.memory_space<vmem>>) attributes {dimension_semantics = [#tpu.dimension_semantics<arbitrary>], iteration_bounds = array<i64: 1>, scalar_prefetch = 0 : i64, scratch_operands = 0 : i64, tpu.core_type = #tpu.core_type<tc>, window_params = [{pipeline_mode = #tpu.pipeline_mode<synchronous>, transform_indices = @transform_0, window_bounds = array<i64: 16, 32>}, {pipeline_mode = #tpu.pipeline_mode<synchronous>, transform_indices = @transform_1, window_bounds = array<i64: 1, 32>}, {pipeline_mode = #tpu.pipeline_mode<synchronous>, transform_indices = @transform_2, window_bounds = array<i64: 1, 32>}, {pipeline_mode = #tpu.pipeline_mode<synchronous>, transform_indices = @transform_3, window_bounds = array<i64: 32, 96>}, {pipeline_mode = #tpu.pipeline_mode<synchronous>, transform_indices = @transform_4, window_bounds = array<i64: 1, 96>}, {pipeline_mode = #tpu.pipeline_mode<synchronous>, transform_indices = @transform_5, window_bounds = array<i64: 32, 32>}, {pipeline_mode = #tpu.pipeline_mode<synchronous>, transform_indices = @transform_6, window_bounds = array<i64: 1, 32>}, {pipeline_mode = #tpu.pipeline_mode<synchronous>, transform_indices = @transform_7, window_bounds = array<i64: 1, 32>}, {pipeline_mode = #tpu.pipeline_mode<synchronous>, transform_indices = @transform_8, window_bounds = array<i64: 1, 32>}, {pipeline_mode = #tpu.pipeline_mode<synchronous>, transform_indices = @transform_9, window_bounds = array<i64: 32, 64>}, {pipeline_mode = #tpu.pipeline_mode<synchronous>, transform_indices = @transform_10, window_bounds = array<i64: 1, 64>}, {pipeline_mode = #tpu.pipeline_mode<synchronous>, transform_indices = @transform_11, window_bounds = array<i64: 64, 32>}, {pipeline_mode = #tpu.pipeline_mode<synchronous>, transform_indices = @transform_12, window_bounds = array<i64: 1, 32>}, {pipeline_mode = #tpu.pipeline_mode<synchronous>, transform_indices = @transform_13, window_bounds = array<i64: 16, 32>}]} {
    %c0 = arith.constant 0 : index
    %c0_0 = arith.constant 0 : index
    %0 = vector.load %arg1[%c0, %c0_0] : memref<16x32xf32, #tpu.memory_space<vmem>>, vector<16x32xf32>
    %cst = arith.constant dense<0.000000e+00> : vector<16xf32>
    %1 = vector.multi_reduction <add>, %0, %cst [1] : vector<16x32xf32> to vector<16xf32>
    %2 = vector.shape_cast %1 : vector<16xf32> to vector<16x1xf32>
    %cst_1 = arith.constant 3.200000e+01 : f32
    %3 = vector.broadcast %cst_1 : f32 to vector<16x1xf32>
    %4 = arith.divf %2, %3 : vector<16x1xf32>
    %5 = vector.broadcast %4 : vector<16x1xf32> to vector<16x32xf32>
    %6 = arith.subf %0, %5 : vector<16x32xf32>
    %7 = arith.mulf %6, %6 : vector<16x32xf32>
    %cst_2 = arith.constant dense<0.000000e+00> : vector<16xf32>
    %8 = vector.multi_reduction <add>, %7, %cst_2 [1] : vector<16x32xf32> to vector<16xf32>
    %9 = vector.shape_cast %8 : vector<16xf32> to vector<16x1xf32>
    %cst_3 = arith.constant 3.200000e+01 : f32
    %10 = vector.broadcast %cst_3 : f32 to vector<16x1xf32>
    %11 = arith.divf %9, %10 : vector<16x1xf32>
    %12 = vector.broadcast %4 : vector<16x1xf32> to vector<16x32xf32>
    %13 = arith.subf %0, %12 : vector<16x32xf32>
    %cst_4 = arith.constant 9.99999997E-7 : f32
    %14 = vector.broadcast %cst_4 : f32 to vector<16x1xf32>
    %15 = arith.addf %11, %14 : vector<16x1xf32>
    %16 = math.rsqrt %15 : vector<16x1xf32>
    %17 = vector.broadcast %16 : vector<16x1xf32> to vector<16x32xf32>
    %18 = arith.mulf %13, %17 : vector<16x32xf32>
    %c0_5 = arith.constant 0 : index
    %c0_6 = arith.constant 0 : index
    %19 = vector.load %arg2[%c0_5, %c0_6] : memref<1x32xf32, #tpu.memory_space<vmem>>, vector<1x32xf32>
    %20 = vector.broadcast %19 : vector<1x32xf32> to vector<16x32xf32>
    %21 = arith.mulf %18, %20 : vector<16x32xf32>
    %c0_7 = arith.constant 0 : index
    %c0_8 = arith.constant 0 : index
    %22 = vector.load %arg3[%c0_7, %c0_8] : memref<1x32xf32, #tpu.memory_space<vmem>>, vector<1x32xf32>
    %23 = vector.broadcast %22 : vector<1x32xf32> to vector<16x32xf32>
    %24 = arith.addf %21, %23 : vector<16x32xf32>
    %c0_9 = arith.constant 0 : index
    %c0_10 = arith.constant 0 : index
    %25 = vector.load %arg4[%c0_9, %c0_10] : memref<32x96xf32, #tpu.memory_space<vmem>>, vector<32x96xf32>
    %cst_11 = arith.constant dense<0.000000e+00> : vector<16x96xf32>
    %26 = tpu.matmul %24, %25, %cst_11 {dimension_numbers = #tpu.dot_dimension_numbers<[1], [0], [0], [1], [0, 0, 1, 1], [], []>} : vector<16x32xf32>, vector<32x96xf32>, vector<16x96xf32> -> vector<16x96xf32>
    %c0_12 = arith.constant 0 : index
    %c0_13 = arith.constant 0 : index
    %27 = vector.load %arg5[%c0_12, %c0_13] : memref<1x96xf32, #tpu.memory_space<vmem>>, vector<1x96xf32>
    %28 = vector.broadcast %27 : vector<1x96xf32> to vector<16x96xf32>
    %29 = arith.addf %26, %28 : vector<16x96xf32>
    %30 = vector.extract_strided_slice %29 {offsets = [0, 0], sizes = [16, 32], strides = [1, 1]} : vector<16x96xf32> to vector<16x32xf32>
    %31 = vector.shape_cast %30 : vector<16x32xf32> to vector<2x8x32xf32>
    %32 = vector.extract_strided_slice %29 {offsets = [0, 32], sizes = [16, 32], strides = [1, 1]} : vector<16x96xf32> to vector<16x32xf32>
    %33 = vector.shape_cast %32 : vector<16x32xf32> to vector<2x8x32xf32>
    %34 = vector.extract_strided_slice %29 {offsets = [0, 64], sizes = [16, 32], strides = [1, 1]} : vector<16x96xf32> to vector<16x32xf32>
    %35 = vector.shape_cast %34 : vector<16x32xf32> to vector<2x8x32xf32>
    %36 = vector.extract_strided_slice %31 {offsets = [0, 0, 0], sizes = [2, 8, 8], strides = [1, 1, 1]} : vector<2x8x32xf32> to vector<2x8x8xf32>
    %37 = vector.extract_strided_slice %33 {offsets = [0, 0, 0], sizes = [2, 8, 8], strides = [1, 1, 1]} : vector<2x8x32xf32> to vector<2x8x8xf32>
    %38 = vector.extract_strided_slice %35 {offsets = [0, 0, 0], sizes = [2, 8, 8], strides = [1, 1, 1]} : vector<2x8x32xf32> to vector<2x8x8xf32>
    "tpu.trace_start"() <{level = 10 : i32, message = "bnd,bmd->bnm"}> : () -> ()
    %cst_14 = arith.constant dense<0.000000e+00> : vector<2x8x8xf32>
    %39 = tpu.matmul %36, %37, %cst_14 {dimension_numbers = #tpu.dot_dimension_numbers<[2], [2], [1], [1], [0, 0, 0, 1, 1, 1], [0], [0]>} : vector<2x8x8xf32>, vector<2x8x8xf32>, vector<2x8x8xf32> -> vector<2x8x8xf32>
    "tpu.trace_stop"() : () -> ()
    %cst_15 = arith.constant 0.353553385 : f32
    %40 = vector.broadcast %cst_15 : f32 to vector<2x8x8xf32>
    %41 = arith.mulf %39, %40 : vector<2x8x8xf32>
    %cst_16 = arith.constant dense<0xFF800000> : vector<2x8xf32>
    %42 = vector.multi_reduction <maximumf>, %41, %cst_16 [2] : vector<2x8x8xf32> to vector<2x8xf32>
    %43 = vector.shape_cast %42 : vector<2x8xf32> to vector<2x8x1xf32>
    %44 = vector.broadcast %43 : vector<2x8x1xf32> to vector<2x8x8xf32>
    %45 = arith.subf %41, %44 : vector<2x8x8xf32>
    %46 = math.exp %45 : vector<2x8x8xf32>
    %cst_17 = arith.constant dense<0.000000e+00> : vector<2x8xf32>
    %47 = vector.multi_reduction <add>, %46, %cst_17 [2] : vector<2x8x8xf32> to vector<2x8xf32>
    %48 = vector.shape_cast %47 : vector<2x8xf32> to vector<2x8x1xf32>
    %49 = tpu.reciprocal %48 : vector<2x8x1xf32> -> vector<2x8x1xf32>
    %50 = vector.broadcast %49 : vector<2x8x1xf32> to vector<2x8x8xf32>
    %51 = arith.mulf %46, %50 : vector<2x8x8xf32>
    "tpu.trace_start"() <{level = 10 : i32, message = "bnm,bmd->bnd"}> : () -> ()
    %cst_18 = arith.constant dense<0.000000e+00> : vector<2x8x8xf32>
    %52 = tpu.matmul %51, %38, %cst_18 {dimension_numbers = #tpu.dot_dimension_numbers<[2], [1], [1], [2], [0, 0, 0, 1, 1, 2], [0], [0]>} : vector<2x8x8xf32>, vector<2x8x8xf32>, vector<2x8x8xf32> -> vector<2x8x8xf32>
    "tpu.trace_stop"() : () -> ()
    %53 = vector.extract_strided_slice %31 {offsets = [0, 0, 8], sizes = [2, 8, 8], strides = [1, 1, 1]} : vector<2x8x32xf32> to vector<2x8x8xf32>
    %54 = vector.extract_strided_slice %33 {offsets = [0, 0, 8], sizes = [2, 8, 8], strides = [1, 1, 1]} : vector<2x8x32xf32> to vector<2x8x8xf32>
    %55 = vector.extract_strided_slice %35 {offsets = [0, 0, 8], sizes = [2, 8, 8], strides = [1, 1, 1]} : vector<2x8x32xf32> to vector<2x8x8xf32>
    "tpu.trace_start"() <{level = 10 : i32, message = "bnd,bmd->bnm"}> : () -> ()
    %cst_19 = arith.constant dense<0.000000e+00> : vector<2x8x8xf32>
    %56 = tpu.matmul %53, %54, %cst_19 {dimension_numbers = #tpu.dot_dimension_numbers<[2], [2], [1], [1], [0, 0, 0, 1, 1, 1], [0], [0]>} : vector<2x8x8xf32>, vector<2x8x8xf32>, vector<2x8x8xf32> -> vector<2x8x8xf32>
    "tpu.trace_stop"() : () -> ()
    %cst_20 = arith.constant 0.353553385 : f32
    %57 = vector.broadcast %cst_20 : f32 to vector<2x8x8xf32>
    %58 = arith.mulf %56, %57 : vector<2x8x8xf32>
    %cst_21 = arith.constant dense<0xFF800000> : vector<2x8xf32>
    %59 = vector.multi_reduction <maximumf>, %58, %cst_21 [2] : vector<2x8x8xf32> to vector<2x8xf32>
    %60 = vector.shape_cast %59 : vector<2x8xf32> to vector<2x8x1xf32>
    %61 = vector.broadcast %60 : vector<2x8x1xf32> to vector<2x8x8xf32>
    %62 = arith.subf %58, %61 : vector<2x8x8xf32>
    %63 = math.exp %62 : vector<2x8x8xf32>
    %cst_22 = arith.constant dense<0.000000e+00> : vector<2x8xf32>
    %64 = vector.multi_reduction <add>, %63, %cst_22 [2] : vector<2x8x8xf32> to vector<2x8xf32>
    %65 = vector.shape_cast %64 : vector<2x8xf32> to vector<2x8x1xf32>
    %66 = tpu.reciprocal %65 : vector<2x8x1xf32> -> vector<2x8x1xf32>
    %67 = vector.broadcast %66 : vector<2x8x1xf32> to vector<2x8x8xf32>
    %68 = arith.mulf %63, %67 : vector<2x8x8xf32>
    "tpu.trace_start"() <{level = 10 : i32, message = "bnm,bmd->bnd"}> : () -> ()
    %cst_23 = arith.constant dense<0.000000e+00> : vector<2x8x8xf32>
    %69 = tpu.matmul %68, %55, %cst_23 {dimension_numbers = #tpu.dot_dimension_numbers<[2], [1], [1], [2], [0, 0, 0, 1, 1, 2], [0], [0]>} : vector<2x8x8xf32>, vector<2x8x8xf32>, vector<2x8x8xf32> -> vector<2x8x8xf32>
    "tpu.trace_stop"() : () -> ()
    %70 = vector.extract_strided_slice %31 {offsets = [0, 0, 16], sizes = [2, 8, 8], strides = [1, 1, 1]} : vector<2x8x32xf32> to vector<2x8x8xf32>
    %71 = vector.extract_strided_slice %33 {offsets = [0, 0, 16], sizes = [2, 8, 8], strides = [1, 1, 1]} : vector<2x8x32xf32> to vector<2x8x8xf32>
    %72 = vector.extract_strided_slice %35 {offsets = [0, 0, 16], sizes = [2, 8, 8], strides = [1, 1, 1]} : vector<2x8x32xf32> to vector<2x8x8xf32>
    "tpu.trace_start"() <{level = 10 : i32, message = "bnd,bmd->bnm"}> : () -> ()
    %cst_24 = arith.constant dense<0.000000e+00> : vector<2x8x8xf32>
    %73 = tpu.matmul %70, %71, %cst_24 {dimension_numbers = #tpu.dot_dimension_numbers<[2], [2], [1], [1], [0, 0, 0, 1, 1, 1], [0], [0]>} : vector<2x8x8xf32>, vector<2x8x8xf32>, vector<2x8x8xf32> -> vector<2x8x8xf32>
    "tpu.trace_stop"() : () -> ()
    %cst_25 = arith.constant 0.353553385 : f32
    %74 = vector.broadcast %cst_25 : f32 to vector<2x8x8xf32>
    %75 = arith.mulf %73, %74 : vector<2x8x8xf32>
    %cst_26 = arith.constant dense<0xFF800000> : vector<2x8xf32>
    %76 = vector.multi_reduction <maximumf>, %75, %cst_26 [2] : vector<2x8x8xf32> to vector<2x8xf32>
    %77 = vector.shape_cast %76 : vector<2x8xf32> to vector<2x8x1xf32>
    %78 = vector.broadcast %77 : vector<2x8x1xf32> to vector<2x8x8xf32>
    %79 = arith.subf %75, %78 : vector<2x8x8xf32>
    %80 = math.exp %79 : vector<2x8x8xf32>
    %cst_27 = arith.constant dense<0.000000e+00> : vector<2x8xf32>
    %81 = vector.multi_reduction <add>, %80, %cst_27 [2] : vector<2x8x8xf32> to vector<2x8xf32>
    %82 = vector.shape_cast %81 : vector<2x8xf32> to vector<2x8x1xf32>
    %83 = tpu.reciprocal %82 : vector<2x8x1xf32> -> vector<2x8x1xf32>
    %84 = vector.broadcast %83 : vector<2x8x1xf32> to vector<2x8x8xf32>
    %85 = arith.mulf %80, %84 : vector<2x8x8xf32>
    "tpu.trace_start"() <{level = 10 : i32, message = "bnm,bmd->bnd"}> : () -> ()
    %cst_28 = arith.constant dense<0.000000e+00> : vector<2x8x8xf32>
    %86 = tpu.matmul %85, %72, %cst_28 {dimension_numbers = #tpu.dot_dimension_numbers<[2], [1], [1], [2], [0, 0, 0, 1, 1, 2], [0], [0]>} : vector<2x8x8xf32>, vector<2x8x8xf32>, vector<2x8x8xf32> -> vector<2x8x8xf32>
    "tpu.trace_stop"() : () -> ()
    %87 = vector.extract_strided_slice %31 {offsets = [0, 0, 24], sizes = [2, 8, 8], strides = [1, 1, 1]} : vector<2x8x32xf32> to vector<2x8x8xf32>
    %88 = vector.extract_strided_slice %33 {offsets = [0, 0, 24], sizes = [2, 8, 8], strides = [1, 1, 1]} : vector<2x8x32xf32> to vector<2x8x8xf32>
    %89 = vector.extract_strided_slice %35 {offsets = [0, 0, 24], sizes = [2, 8, 8], strides = [1, 1, 1]} : vector<2x8x32xf32> to vector<2x8x8xf32>
    "tpu.trace_start"() <{level = 10 : i32, message = "bnd,bmd->bnm"}> : () -> ()
    %cst_29 = arith.constant dense<0.000000e+00> : vector<2x8x8xf32>
    %90 = tpu.matmul %87, %88, %cst_29 {dimension_numbers = #tpu.dot_dimension_numbers<[2], [2], [1], [1], [0, 0, 0, 1, 1, 1], [0], [0]>} : vector<2x8x8xf32>, vector<2x8x8xf32>, vector<2x8x8xf32> -> vector<2x8x8xf32>
    "tpu.trace_stop"() : () -> ()
    %cst_30 = arith.constant 0.353553385 : f32
    %91 = vector.broadcast %cst_30 : f32 to vector<2x8x8xf32>
    %92 = arith.mulf %90, %91 : vector<2x8x8xf32>
    %cst_31 = arith.constant dense<0xFF800000> : vector<2x8xf32>
    %93 = vector.multi_reduction <maximumf>, %92, %cst_31 [2] : vector<2x8x8xf32> to vector<2x8xf32>
    %94 = vector.shape_cast %93 : vector<2x8xf32> to vector<2x8x1xf32>
    %95 = vector.broadcast %94 : vector<2x8x1xf32> to vector<2x8x8xf32>
    %96 = arith.subf %92, %95 : vector<2x8x8xf32>
    %97 = math.exp %96 : vector<2x8x8xf32>
    %cst_32 = arith.constant dense<0.000000e+00> : vector<2x8xf32>
    %98 = vector.multi_reduction <add>, %97, %cst_32 [2] : vector<2x8x8xf32> to vector<2x8xf32>
    %99 = vector.shape_cast %98 : vector<2x8xf32> to vector<2x8x1xf32>
    %100 = tpu.reciprocal %99 : vector<2x8x1xf32> -> vector<2x8x1xf32>
    %101 = vector.broadcast %100 : vector<2x8x1xf32> to vector<2x8x8xf32>
    %102 = arith.mulf %97, %101 : vector<2x8x8xf32>
    "tpu.trace_start"() <{level = 10 : i32, message = "bnm,bmd->bnd"}> : () -> ()
    %cst_33 = arith.constant dense<0.000000e+00> : vector<2x8x8xf32>
    %103 = tpu.matmul %102, %89, %cst_33 {dimension_numbers = #tpu.dot_dimension_numbers<[2], [1], [1], [2], [0, 0, 0, 1, 1, 2], [0], [0]>} : vector<2x8x8xf32>, vector<2x8x8xf32>, vector<2x8x8xf32> -> vector<2x8x8xf32>
    "tpu.trace_stop"() : () -> ()
    %104 = tpu.concatenate %52, %69, %86, %103 in 2 : vector<2x8x8xf32>, vector<2x8x8xf32>, vector<2x8x8xf32>, vector<2x8x8xf32> -> vector<2x8x32xf32>
    %105 = vector.shape_cast %104 : vector<2x8x32xf32> to vector<16x32xf32>
    %c0_34 = arith.constant 0 : index
    %c0_35 = arith.constant 0 : index
    %106 = vector.load %arg6[%c0_34, %c0_35] : memref<32x32xf32, #tpu.memory_space<vmem>>, vector<32x32xf32>
    %cst_36 = arith.constant dense<0.000000e+00> : vector<16x32xf32>
    %107 = tpu.matmul %105, %106, %cst_36 {dimension_numbers = #tpu.dot_dimension_numbers<[1], [0], [0], [1], [0, 0, 1, 1], [], []>} : vector<16x32xf32>, vector<32x32xf32>, vector<16x32xf32> -> vector<16x32xf32>
    %c0_37 = arith.constant 0 : index
    %c0_38 = arith.constant 0 : index
    %108 = vector.load %arg7[%c0_37, %c0_38] : memref<1x32xf32, #tpu.memory_space<vmem>>, vector<1x32xf32>
    %109 = vector.broadcast %108 : vector<1x32xf32> to vector<16x32xf32>
    %110 = arith.addf %107, %109 : vector<16x32xf32>
    %111 = arith.addf %0, %110 : vector<16x32xf32>
    %cst_39 = arith.constant dense<0.000000e+00> : vector<16xf32>
    %112 = vector.multi_reduction <add>, %111, %cst_39 [1] : vector<16x32xf32> to vector<16xf32>
    %113 = vector.shape_cast %112 : vector<16xf32> to vector<16x1xf32>
    %cst_40 = arith.constant 3.200000e+01 : f32
    %114 = vector.broadcast %cst_40 : f32 to vector<16x1xf32>
    %115 = arith.divf %113, %114 : vector<16x1xf32>
    %116 = vector.broadcast %115 : vector<16x1xf32> to vector<16x32xf32>
    %117 = arith.subf %111, %116 : vector<16x32xf32>
    %118 = arith.mulf %117, %117 : vector<16x32xf32>
    %cst_41 = arith.constant dense<0.000000e+00> : vector<16xf32>
    %119 = vector.multi_reduction <add>, %118, %cst_41 [1] : vector<16x32xf32> to vector<16xf32>
    %120 = vector.shape_cast %119 : vector<16xf32> to vector<16x1xf32>
    %cst_42 = arith.constant 3.200000e+01 : f32
    %121 = vector.broadcast %cst_42 : f32 to vector<16x1xf32>
    %122 = arith.divf %120, %121 : vector<16x1xf32>
    %123 = vector.broadcast %115 : vector<16x1xf32> to vector<16x32xf32>
    %124 = arith.subf %111, %123 : vector<16x32xf32>
    %cst_43 = arith.constant 9.99999997E-7 : f32
    %125 = vector.broadcast %cst_43 : f32 to vector<16x1xf32>
    %126 = arith.addf %122, %125 : vector<16x1xf32>
    %127 = math.rsqrt %126 : vector<16x1xf32>
    %128 = vector.broadcast %127 : vector<16x1xf32> to vector<16x32xf32>
    %129 = arith.mulf %124, %128 : vector<16x32xf32>
    %c0_44 = arith.constant 0 : index
    %c0_45 = arith.constant 0 : index
    %130 = vector.load %arg8[%c0_44, %c0_45] : memref<1x32xf32, #tpu.memory_space<vmem>>, vector<1x32xf32>
    %131 = vector.broadcast %130 : vector<1x32xf32> to vector<16x32xf32>
    %132 = arith.mulf %129, %131 : vector<16x32xf32>
    %c0_46 = arith.constant 0 : index
    %c0_47 = arith.constant 0 : index
    %133 = vector.load %arg9[%c0_46, %c0_47] : memref<1x32xf32, #tpu.memory_space<vmem>>, vector<1x32xf32>
    %134 = vector.broadcast %133 : vector<1x32xf32> to vector<16x32xf32>
    %135 = arith.addf %132, %134 : vector<16x32xf32>
    %c0_48 = arith.constant 0 : index
    %c0_49 = arith.constant 0 : index
    %136 = vector.load %arg10[%c0_48, %c0_49] : memref<32x64xf32, #tpu.memory_space<vmem>>, vector<32x64xf32>
    %cst_50 = arith.constant dense<0.000000e+00> : vector<16x64xf32>
    %137 = tpu.matmul %135, %136, %cst_50 {dimension_numbers = #tpu.dot_dimension_numbers<[1], [0], [0], [1], [0, 0, 1, 1], [], []>} : vector<16x32xf32>, vector<32x64xf32>, vector<16x64xf32> -> vector<16x64xf32>
    %c0_51 = arith.constant 0 : index
    %c0_52 = arith.constant 0 : index
    %138 = vector.load %arg11[%c0_51, %c0_52] : memref<1x64xf32, #tpu.memory_space<vmem>>, vector<1x64xf32>
    %139 = vector.broadcast %138 : vector<1x64xf32> to vector<16x64xf32>
    %140 = arith.addf %137, %139 : vector<16x64xf32>
    %cst_53 = arith.constant 1.702000e+00 : f32
    %141 = vector.broadcast %cst_53 : f32 to vector<16x64xf32>
    %142 = arith.mulf %141, %140 : vector<16x64xf32>
    %143 = arith.negf %142 : vector<16x64xf32>
    %144 = math.exp %143 : vector<16x64xf32>
    %cst_54 = arith.constant 1.000000e+00 : f32
    %145 = vector.broadcast %cst_54 : f32 to vector<16x64xf32>
    %146 = arith.addf %145, %144 : vector<16x64xf32>
    %147 = arith.divf %145, %146 : vector<16x64xf32>
    %148 = arith.mulf %140, %147 : vector<16x64xf32>
    %c0_55 = arith.constant 0 : index
    %c0_56 = arith.constant 0 : index
    %149 = vector.load %arg12[%c0_55, %c0_56] : memref<64x32xf32, #tpu.memory_space<vmem>>, vector<64x32xf32>
    %cst_57 = arith.constant dense<0.000000e+00> : vector<16x32xf32>
    %150 = tpu.matmul %148, %149, %cst_57 {dimension_numbers = #tpu.dot_dimension_numbers<[1], [0], [0], [1], [0, 0, 1, 1], [], []>} : vector<16x64xf32>, vector<64x32xf32>, vector<16x32xf32> -> vector<16x32xf32>
    %c0_58 = arith.constant 0 : index
    %c0_59 = arith.constant 0 : index
    %151 = vector.load %arg13[%c0_58, %c0_59] : memref<1x32xf32, #tpu.memory_space<vmem>>, vector<1x32xf32>
    %152 = vector.broadcast %151 : vector<1x32xf32> to vector<16x32xf32>
    %153 = arith.addf %150, %152 : vector<16x32xf32>
    %154 = arith.addf %111, %153 : vector<16x32xf32>
    %c0_60 = arith.constant 0 : index
    %c0_61 = arith.constant 0 : index
    %155 = vector.load %arg14[%c0_60, %c0_61] : memref<16x32xf32, #tpu.memory_space<vmem>>, vector<16x32xf32>
    tpu.vector_store %arg14[%c0_60, %c0_61], %154 {strides = array<i32>} : memref<16x32xf32, #tpu.memory_space<vmem>>, vector<16x32xf32>,
    return
  }
  func.func @transform_0(%arg0: i32) -> (i32, i32) {
    %c0_i32 = arith.constant 0 : i32
    %c0_i32_0 = arith.constant 0 : i32
    %c0_i32_1 = arith.constant 0 : i32
    return %c0_i32, %c0_i32_0 : i32, i32
  }
  func.func @transform_1(%arg0: i32) -> (i32, i32) {
    %c0_i32 = arith.constant 0 : i32
    %c0_i32_0 = arith.constant 0 : i32
    %c0_i32_1 = arith.constant 0 : i32
    return %c0_i32, %c0_i32_0 : i32, i32
  }
  func.func @transform_2(%arg0: i32) -> (i32, i32) {
    %c0_i32 = arith.constant 0 : i32
    %c0_i32_0 = arith.constant 0 : i32
    %c0_i32_1 = arith.constant 0 : i32
    return %c0_i32, %c0_i32_0 : i32, i32
  }
  func.func @transform_3(%arg0: i32) -> (i32, i32) {
    %c0_i32 = arith.constant 0 : i32
    %c0_i32_0 = arith.constant 0 : i32
    %c0_i32_1 = arith.constant 0 : i32
    return %c0_i32, %c0_i32_0 : i32, i32
  }
  func.func @transform_4(%arg0: i32) -> (i32, i32) {
    %c0_i32 = arith.constant 0 : i32
    %c0_i32_0 = arith.constant 0 : i32
    %c0_i32_1 = arith.constant 0 : i32
    return %c0_i32, %c0_i32_0 : i32, i32
  }
  func.func @transform_5(%arg0: i32) -> (i32, i32) {
    %c0_i32 = arith.constant 0 : i32
    %c0_i32_0 = arith.constant 0 : i32
    %c0_i32_1 = arith.constant 0 : i32
    return %c0_i32, %c0_i32_0 : i32, i32
  }
  func.func @transform_6(%arg0: i32) -> (i32, i32) {
    %c0_i32 = arith.constant 0 : i32
    %c0_i32_0 = arith.constant 0 : i32
    %c0_i32_1 = arith.constant 0 : i32
    return %c0_i32, %c0_i32_0 : i32, i32
  }
  func.func @transform_7(%arg0: i32) -> (i32, i32) {
    %c0_i32 = arith.constant 0 : i32
    %c0_i32_0 = arith.constant 0 : i32
    %c0_i32_1 = arith.constant 0 : i32
    return %c0_i32, %c0_i32_0 : i32, i32
  }
  func.func @transform_8(%arg0: i32) -> (i32, i32) {
    %c0_i32 = arith.constant 0 : i32
    %c0_i32_0 = arith.constant 0 : i32
    %c0_i32_1 = arith.constant 0 : i32
    return %c0_i32, %c0_i32_0 : i32, i32
  }
  func.func @transform_9(%arg0: i32) -> (i32, i32) {
    %c0_i32 = arith.constant 0 : i32
    %c0_i32_0 = arith.constant 0 : i32
    %c0_i32_1 = arith.constant 0 : i32
    return %c0_i32, %c0_i32_0 : i32, i32
  }
  func.func @transform_10(%arg0: i32) -> (i32, i32) {
    %c0_i32 = arith.constant 0 : i32
    %c0_i32_0 = arith.constant 0 : i32
    %c0_i32_1 = arith.constant 0 : i32
    return %c0_i32, %c0_i32_0 : i32, i32
  }
  func.func @transform_11(%arg0: i32) -> (i32, i32) {
    %c0_i32 = arith.constant 0 : i32
    %c0_i32_0 = arith.constant 0 : i32
    %c0_i32_1 = arith.constant 0 : i32
    return %c0_i32, %c0_i32_0 : i32, i32
  }
  func.func @transform_12(%arg0: i32) -> (i32, i32) {
    %c0_i32 = arith.constant 0 : i32
    %c0_i32_0 = arith.constant 0 : i32
    %c0_i32_1 = arith.constant 0 : i32
    return %c0_i32, %c0_i32_0 : i32, i32
  }
  func.func @transform_13(%arg0: i32) -> (i32, i32) {
    %c0_i32 = arith.constant 0 : i32
    %c0_i32_0 = arith.constant 0 : i32
    %c0_i32_1 = arith.constant 0 : i32
    return %c0_i32, %c0_i32_0 : i32, i32
  }
}

</mosaic_0001>

<bundles_post_ra>
// kernel: tpu_custom_call.1
= control target key start
LH: loop header
LB: loop body
LE: loop exit
PB: predicated region body
PF: predicated region fallthrough
CT: control target
= control target key end

     0   :  { %18 = vsyncpa [#allocation3], 0  ;;  %s2682_s0 = inlined_call_operand.hbm [shape: f32[16,32], index: 0, kind: input, shape index: {}]   ;;  %s2683_s1 = inlined_call_operand.vmem [shape: f32[1,32], index: 1, kind: input, shape index: {}]   ;;  %s2684_s2 = inlined_call_operand.vmem [shape: f32[1,32], index: 2, kind: input, shape index: {}]   ;;  %s2685_s3 = inlined_call_operand.vmem [shape: f32[32,96], index: 3, kind: input, shape index: {}]   ;;  %s2686_s4 = inlined_call_operand.vmem [shape: f32[1,96], index: 4, kind: input, shape index: {}]   ;;  %s2687_s5 = inlined_call_operand.vmem [shape: f32[32,32], index: 5, kind: input, shape index: {}]   ;;  %s2688_s6 = inlined_call_operand.vmem [shape: f32[1,32], index: 6, kind: input, shape index: {}]   ;;  %s2689_s7 = inlined_call_operand.vmem [shape: f32[1,32], index: 7, kind: input, shape index: {}]   ;;  %s2690_s8 = inlined_call_operand.vmem [shape: f32[1,32], index: 8, kind: input, shape index: {}]   ;;  %s2691_s9 = inlined_call_operand.vmem [shape: f32[32,64], index: 9, kind: input, shape index: {}]   ;;  %s2692_s10 = inlined_call_operand.vmem [shape: f32[1,64], index: 10, kind: input, shape index: {}]   ;;  %s2693_s11 = inlined_call_operand.vmem [shape: f32[64,32], index: 11, kind: input, shape index: {}]   ;;  %s2694_s12 = inlined_call_operand.vmem [shape: f32[1,32], index: 12, kind: input, shape index: {}]   ;;  %s2695_s13 = inlined_call_operand.hbm [shape: f32[16,32], index: 13, kind: output, shape index: {}]  }
   0x1   :  { %19 = vsyncpa [#allocation4], 0  ;;  %s2311_s25 = smov [#allocation2]   ;;  %s2263_s29 = scalar_lea.hbm %s2682_s0, 256 }
   0x2   :  { %s25_s26 = sshll.u32 %s2311_s25, 4  ;;  %p2264_p0 = scmp.ne.s32.totalorder %s2682_s0, %s2263_s29  ;;  %s26_s26 = int_to_ptr.vmem [resolvable:$true] %s25_s26 }
   0x3   :  { %p2267_p1 = scmp.lt.u32.totalorder %s2263_s29, %s2682_s0 }
   0x5   :  { %p2269_p2 = pnand %p2267_p1, %p2264_p0 }
   0x7   :  { %2272 = shalt.err (!%p2269_p2)
}
   0x8   :  { %s2273_s17 = scalar_lea.vmem %s26_s26, 256  ;;  %p2278_p4 = scmp.lt.s32.totalorder %s26_s26, %s26_s26 }
   0x9   :  { %p2274_p3 = scmp.ne.s32.totalorder %s26_s26, %s2273_s17  ;;  %p2279_p5 = scmp.lt.s32.totalorder %s2273_s17, %s2273_s17 }
   0xb   :  { %p2280_p6 = por %p2279_p5, %p2278_p4 }
   0xd   :  { %p2281_p7 = pnand %p2280_p6, %p2274_p3 }
   0xf   :  { %2284 = shalt.err (!%p2281_p7)
}
  0x10   :  { %s2312_s18 = smov 128   ;;  %s2313_s19 = smov 8  }
  0x11   :  { %31 = dma.hbm_to_vmem [thread:$0]  %s2682_s0, 256, %s26_s26, [#allocation3], %s2312_s18, %s2312_s18, %s2313_s19  }
  0x12   :  { %2307 = dma.done.wait [#allocation3], 256  }
  0x13   :  { %2308 = vsyncadd [#allocation3], 4294967040  ;;  %vm61_vm0 = vcmask 261120   ;;  %v2415_v0 = vld [vmem:[#allocation2] sm:$0xff]  ;;  %v2417_v1 = vld [vmem:[#allocation2 + $0x8] sm:$0xff]  ;;  %v2314_v36 = vmov 0.0  }
  0x14   :  { %v62_v2 = vsel %vm61_vm0, %v2415_v0, 0.0  ;;  %v65_v3 = vsel %vm61_vm0, %v2417_v1, 0.0  ;;  %v107_v14 = vld [vmem:[%s2685_s3] sm:$0xff]  ;;  %v108_v15 = vld [vmem:[%s2685_s3 + $0x8] sm:$0xff]  ;;  %v109_v16 = vld [vmem:[%s2685_s3 + $0x10] sm:$0xff]  ;;  %2045 = vmatprep.subr.mxu0 %v2314_v36  ;;  %vm2315_vm1 = vmmov 0  }
  0x15   :  { %63 = vadd.xlane.f32.xlu0 %v62_v2  ;;  %v2156_v17 = vpack.c.bf16 %v108_v15, %v107_v14  ;;  %v110_v18 = vld [vmem:[%s2685_s3 + $0x18] sm:$0xff]  ;;  %v1922_v27 = vld [vmem:[%s2683_s1] ss:$0 sm:$0xff]  ;;  %2047 = vmatprep.mubr.msk.f32.mxu0 %vm2315_vm1, %v2314_v36  ;;  %s2316_s15 = smov 96   ;;  %vm202_vm2 = vcmask 64512   ;;  %s2318_s16 = smov 88  }
  0x16   :  { %v2160_v19 = vpack.c.bf16 %v110_v18, %v109_v16  ;;  %v1923_v29 = vld [vmem:[%s2684_s2] ss:$0 sm:$0xff]  ;;  %s2319_s17 = smov 120   ;;  %s2320_s20 = smov 56   ;;  %vm1555_vm3 = vcmask 195584   ;;  %vm1552_vm4 = vcmask 130048  }
  0x17   :  { %2157 = vmatprep.subr.bf16.mxu1 %v2156_v17  ;;  %v1924_v37 = vld [vmem:[%s2686_s4] ss:$0 sm:$0xff]  ;;  %s2317_s4 = smov 64   ;;  %s2321_s21 = smov 80   ;;  %vm1819_vm5 = vcmask 523264  }
  0x18   :  { %2159 = vmatpush3.bf16.msra.mxu1 %v2156_v17  ;;  %s2322_s0 = smov 112   ;;  %s2323_s22 = smov 48  }
  0x19   :  { %66 = vadd.xlane.f32.xlu0 %v65_v3  ;;  %2161 = vmatprep.subr.bf16.mxu1 %v2160_v19  ;;  %s2324_s23 = smov 72   ;;  %s2325_s24 = smov 104  }
  0x1a   :  { %s2326_s25 = smov 40   ;;  %s2327_s26 = smov 16  }
  0x1c   :  { %2163 = vmatpush3.bf16.msra.mxu1 %v2160_v19 }
  0x1d   :  { %2035 = vmatprep.subr.mxu1 %v2314_v36 }
  0xa2   :  { %v64_v4 = vpop.xlane.xlu0 %63 }
  0xa3   :  { %v69_v5 = vmul.f32 0.03125, %v64_v4 }
  0xa5   :  { %v71_v6 = vsub.f32 %v2415_v0, %v69_v5 }
  0xa6   :  { %v67_v7 = vpop.xlane.xlu0 %66 }
  0xa7   :  { %v70_v8 = vmul.f32 0.03125, %v67_v7  ;;  %v73_v9 = vmul.f32 %v71_v6, %v71_v6 }
  0xa9   :  { %v72_v10 = vsub.f32 %v2417_v1, %v70_v8  ;;  %v75_v11 = vsel %vm61_vm0, %v73_v9, 0.0 }
  0xaa   :  { %76 = vadd.xlane.f32.xlu1 %v75_v11 }
  0xab   :  { %v74_v12 = vmul.f32 %v72_v10, %v72_v10 }
  0xad   :  { %v78_v13 = vsel %vm61_vm0, %v74_v12, 0.0 }
  0xae   :  { %79 = vadd.xlane.f32.xlu1 %v78_v13 }
 0x137   :  { %v77_v20 = vpop.xlane.xlu1 %76 }
 0x138   :  { %v81_v21 = vmul.f32 0.03125, %v77_v20 }
 0x13a   :  { %v83_v22 = vadd.f32 1e-06, %v81_v21 }
 0x13b   :  { %v80_v23 = vpop.xlane.xlu1 %79 }
 0x13c   :  { %2215 = vrsqrt.f32 %v83_v22  ;;  %v82_v24 = vmul.f32 0.03125, %v80_v23 }
 0x13e   :  { %v84_v25 = vadd.f32 1e-06, %v82_v24 }
 0x140   :  { %2217 = vrsqrt.f32 %v84_v25 }
 0x146   :  { %v2216_v26 = vpop.eup %2215 }
 0x147   :  { %v87_v28 = vmul.f32 %v2216_v26, %v71_v6 }
 0x149   :  { %v96_v30 = vmul.f32 %v1922_v27, %v87_v28 }
 0x14a   :  { %v2218_v31 = vpop.eup %2217 }
 0x14b   :  { %v88_v32 = vmul.f32 %v2218_v31, %v72_v10  ;;  %v105_v33 = vadd.f32 %v1923_v29, %v96_v30 }
 0x14d   :  { %v97_v34 = vmul.f32 %v1922_v27, %v88_v32  ;;  %2032 = vmatprep.mubr.msk.f32.mxu1 %vm61_vm0, %v105_v33 }
 0x14f   :  { %v106_v35 = vadd.f32 %v1923_v29, %v97_v34 }
 0x151   :  { %2033 = vmatmul.mubr.msk.f32.vlgmr.msra.gmra.mrb[0].mxu1 %vm61_vm0, %v106_v35 }
 0x152   :  { %2037 = vmatprep.mubr.msk.f32.mxu1 %vm2315_vm1, %v2314_v36 }
 0x224   :  { %v2034_v38 = vpop.f32.mrb[0].mxu1 }
 0x225   :  { %v2456_v39 = vadd.f32 %v2034_v38, %v1924_v37  ;;  %v190_v40 = vpop.f32.mrb[1].mxu1 }
 0x226   :  { %v2458_v41 = vadd.f32 %v1924_v37, %v190_v40 }
 0x227   :  { %278 = vrot.lane.b32.xlu1 %v2456_v39, %s2316_s15 }
 0x228   :  { %200 = vrot.lane.b32.xlu0 %v2458_v41, %s2316_s15  ;;  %s2328_s15 = smov 24  }
 0x299   :  { %v279_v43 = vpop.permute.xlu1 %278 }
 0x29a   :  { %v201_v42 = vpop.permute.xlu0 %200 }
 0x29b   :  { %2036 = vmatpush3.xpose.msk.msra.mxu1 %vm202_vm2, %v201_v42 }
 0x29c   :  { %2040 = vmatprep.subr.mxu1 %v2314_v36 }
 0x29e   :  { %2038 = vmatmul.mubr.msk.f32.vlgmr.msra.gmra.mrb[2].mxu1 %vm202_vm2, %v2458_v41 }
 0x29f   :  { %2041 = vmatpush3.xpose.msk.msra.mxu1 %vm202_vm2, %v279_v43  ;;  %2042 = vmatprep.mubr.msk.f32.mxu1 %vm2315_vm1, %v2314_v36 }
 0x2a0   :  { %2050 = vmatprep.subr.mxu1 %v2314_v36 }
 0x2a2   :  { %2043 = vmatmul.mubr.msk.f32.vlgmr.msra.gmra.mrb[4].mxu1 %vm202_vm2, %v2456_v39 }
 0x2a3   :  { %2052 = vmatprep.mubr.msk.f32.mxu1 %vm2315_vm1, %v2314_v36 }
 0x371   :  { %v273_v44 = vpop.f32.mrb[2].mxu1 }
 0x372   :  { %v354_v45 = vmul.f32 0.35355338, %v273_v44  ;;  %v2039_v46 = vpop.f32.mrb[3].mxu1 }
 0x374   :  { %v356_v47 = vsel %vm202_vm2, %v354_v45, -inf }
 0x375   :  { %357 = vmax.xlane.f32.xlu1 %v356_v47  ;;  %v350_v48 = vpop.f32.mrb[4].mxu1 }
 0x376   :  { %v355_v49 = vmul.f32 0.35355338, %v350_v48  ;;  %v2044_v50 = vpop.f32.mrb[5].mxu1 }
 0x378   :  { %v359_v51 = vsel %vm202_vm2, %v355_v49, -inf }
 0x379   :  { %360 = vmax.xlane.f32.xlu0 %v359_v51 }
 0x386   :  { %454 = vrot.lane.b32.xlu1 %v2456_v39, %s2317_s4 }
 0x38a   :  { %532 = vrot.lane.b32.xlu1 %v2458_v41, %s2318_s16 }
 0x38e   :  { %610 = vrot.lane.b32.xlu1 %v2456_v39, %s2318_s16 }
 0x38f   :  { %378 = vrot.lane.b32.xlu0 %v2458_v41, %s2317_s4 }
 0x402   :  { %v358_v52 = vpop.xlane.xlu1 %357 }
 0x403   :  { %v362_v53 = vsub.f32 %v354_v45, %v358_v52 }
 0x405   :  { %v364_v54 = vmul.f32 1.442695, %v362_v53 }
 0x406   :  { %v455_v55 = vpop.permute.xlu1 %454  ;;  %v361_v56 = vpop.xlane.xlu0 %360 }
 0x407   :  { %2219 = vpow2.f32 %v364_v54  ;;  %v363_v57 = vsub.f32 %v355_v49, %v361_v56  ;;  %2051 = vmatpush3.msra.mxu1 %v455_v55 }
 0x408   :  { %2060 = vmatprep.subr.mxu1 %v2314_v36 }
 0x409   :  { %v366_v58 = vmul.f32 1.442695, %v363_v57 }
 0x40a   :  { %v379_v59 = vpop.permute.xlu0 %378  ;;  %v533_v2 = vpop.permute.xlu1 %532 }
 0x40b   :  { %2221 = vpow2.f32 %v366_v58  ;;  %2046 = vmatpush3.msra.mxu0 %v379_v59 }
 0x40c   :  { %2055 = vmatprep.subr.mxu0 %v2314_v36 }
 0x40e   :  { %v611_v3 = vpop.permute.xlu1 %610 }
 0x411   :  { %v2220_v60 = vpop.eup %2219 }
 0x412   :  { %v368_v61 = vsel %vm202_vm2, %v2220_v60, 0.0 }
 0x413   :  { %369 = vadd.xlane.f32.xlu0 %v368_v61 }
 0x415   :  { %v2222_v62 = vpop.eup %2221 }
 0x416   :  { %v371_v63 = vsel %vm202_vm2, %v2222_v62, 0.0 }
 0x417   :  { %372 = vadd.xlane.f32.xlu1 %v371_v63 }
 0x428   :  { %608 = vrot.lane.b32.xlu1 %v2456_v39, %s2319_s17 }
 0x429   :  { %530 = vrot.lane.b32.xlu0 %v2458_v41, %s2319_s17 }
 0x4a0   :  { %v370_v4 = vpop.xlane.xlu0 %369 }
 0x4a1   :  { %2223 = vrcp.f32 %v370_v4 }
 0x4a4   :  { %v373_v5 = vpop.xlane.xlu1 %372  ;;  %v531_v10 = vpop.permute.xlu0 %530 }
 0x4a5   :  { %2225 = vrcp.f32 %v373_v5 }
 0x4a8   :  { %v609_v11 = vpop.permute.xlu1 %608 }
 0x4ab   :  { %v2224_v6 = vpop.eup %2223 }
 0x4ac   :  { %v376_v7 = vmul.f32 %v2224_v6, %v2220_v60 }
 0x4ae   :  { %2048 = vmatmul.mubr.msk.f32.vlgmr.msra.gmra.mrb[0].mxu0 %vm202_vm2, %v376_v7 }
 0x4af   :  { %v2226_v8 = vpop.eup %2225  ;;  %2056 = vmatpush3.xpose.msk.msra.mxu0 %vm202_vm2, %v533_v2  ;;  %2057 = vmatprep.mubr.msk.f32.mxu0 %vm2315_vm1, %v2314_v36 }
 0x4b0   :  { %v377_v9 = vmul.f32 %v2226_v8, %v2222_v62  ;;  %2065 = vmatprep.subr.mxu0 %v2314_v36 }
 0x4b2   :  { %2053 = vmatmul.mubr.msk.f32.vlgmr.msra.gmra.mrb[6].mxu1 %vm202_vm2, %v377_v9  ;;  %2058 = vmatmul.mubr.msk.f32.vlgmr.msra.gmra.mrb[2].mxu0 %vm202_vm2, %v531_v10 }
 0x4b3   :  { %2061 = vmatpush3.xpose.msk.msra.mxu1 %vm202_vm2, %v611_v3  ;;  %2062 = vmatprep.mubr.msk.f32.mxu1 %vm2315_vm1, %v2314_v36 }
 0x4b4   :  { %2070 = vmatprep.subr.mxu1 %v2314_v36  ;;  %2067 = vmatprep.mubr.msk.f32.mxu0 %vm2315_vm1, %v2314_v36 }
 0x4b6   :  { %2063 = vmatmul.mubr.msk.f32.vlgmr.msra.gmra.mrb[8].mxu1 %vm202_vm2, %v609_v11 }
 0x4b7   :  { %2072 = vmatprep.mubr.msk.f32.mxu1 %vm2315_vm1, %v2314_v36 }
 0x581   :  { %v2502_v12 = vpop.f32.mrb[0].mxu0 }
 0x582   :  { %v2049_v13 = vpop.f32.mrb[1].mxu0 }
 0x585   :  { %v2504_v14 = vpop.f32.mrb[6].mxu1  ;;  %v604_v15 = vpop.f32.mrb[2].mxu0 }
 0x586   :  { %v686_v16 = vmul.f32 0.35355338, %v604_v15  ;;  %v2054_v17 = vpop.f32.mrb[7].mxu1  ;;  %v2059_v18 = vpop.f32.mrb[3].mxu0 }
 0x588   :  { %v688_v19 = vsel %vm202_vm2, %v686_v16, -inf }
 0x589   :  { %689 = vmax.xlane.f32.xlu0 %v688_v19  ;;  %v682_v20 = vpop.f32.mrb[8].mxu1 }
 0x58a   :  { %v687_v21 = vmul.f32 0.35355338, %v682_v20  ;;  %v2064_v22 = vpop.f32.mrb[9].mxu1 }
 0x58c   :  { %v691_v23 = vsel %vm202_vm2, %v687_v21, -inf }
 0x58d   :  { %692 = vmax.xlane.f32.xlu1 %v691_v23 }
 0x59e   :  { %786 = vrot.lane.b32.xlu1 %v2456_v39, %s2320_s20 }
 0x59f   :  { %710 = vrot.lane.b32.xlu0 %v2458_v41, %s2320_s20 }
 0x5a2   :  { %864 = vrot.lane.b32.xlu1 %v2458_v41, %s2321_s21 }
 0x5a6   :  { %942 = vrot.lane.b32.xlu1 %v2456_v39, %s2321_s21 }
 0x5aa   :  { %940 = vrot.lane.b32.xlu1 %v2456_v39, %s2322_s0 }
 0x616   :  { %v690_v24 = vpop.xlane.xlu0 %689 }
 0x617   :  { %v694_v25 = vsub.f32 %v686_v16, %v690_v24 }
 0x619   :  { %v696_v26 = vmul.f32 1.442695, %v694_v25 }
 0x61a   :  { %v711_v27 = vpop.permute.xlu0 %710  ;;  %v693_v28 = vpop.xlane.xlu1 %692 }
 0x61b   :  { %2227 = vpow2.f32 %v696_v26  ;;  %v695_v29 = vsub.f32 %v687_v21, %v693_v28  ;;  %2066 = vmatpush3.msra.mxu0 %v711_v27 }
 0x61c   :  { %2075 = vmatprep.subr.mxu0 %v2314_v36 }
 0x61d   :  { %v698_v30 = vmul.f32 1.442695, %v695_v29 }
 0x61e   :  { %v787_v31 = vpop.permute.xlu1 %786 }
 0x61f   :  { %2229 = vpow2.f32 %v698_v30  ;;  %2071 = vmatpush3.msra.mxu1 %v787_v31 }
 0x620   :  { %2080 = vmatprep.subr.mxu1 %v2314_v36 }
 0x622   :  { %v865_v40 = vpop.permute.xlu1 %864 }
 0x625   :  { %v2228_v32 = vpop.eup %2227 }
 0x626   :  { %v700_v33 = vsel %vm202_vm2, %v2228_v32, 0.0  ;;  %v943_v45 = vpop.permute.xlu1 %942 }
 0x627   :  { %701 = vadd.xlane.f32.xlu0 %v700_v33 }
 0x629   :  { %v2230_v34 = vpop.eup %2229 }
 0x62a   :  { %v703_v35 = vsel %vm202_vm2, %v2230_v34, 0.0  ;;  %v941_v48 = vpop.permute.xlu1 %940 }
 0x62b   :  { %704 = vadd.xlane.f32.xlu0 %v703_v35 }
 0x641   :  { %862 = vrot.lane.b32.xlu0 %v2458_v41, %s2322_s0  ;;  %s2329_s0 = smov [#allocation5]  }
 0x6b4   :  { %v702_v37 = vpop.xlane.xlu0 %701 }
 0x6b5   :  { %2231 = vrcp.f32 %v702_v37 }
 0x6b8   :  { %v705_v38 = vpop.xlane.xlu0 %704 }
 0x6b9   :  { %2233 = vrcp.f32 %v705_v38 }
 0x6bc   :  { %v863_v47 = vpop.permute.xlu0 %862 }
 0x6bf   :  { %v2232_v42 = vpop.eup %2231 }
 0x6c0   :  { %v708_v43 = vmul.f32 %v2232_v42, %v2228_v32 }
 0x6c2   :  { %2068 = vmatmul.mubr.msk.f32.vlgmr.msra.gmra.mrb[4].mxu0 %vm202_vm2, %v708_v43 }
 0x6c3   :  { %v2234_v44 = vpop.eup %2233  ;;  %2076 = vmatpush3.xpose.msk.msra.mxu0 %vm202_vm2, %v865_v40  ;;  %2077 = vmatprep.mubr.msk.f32.mxu0 %vm2315_vm1, %v2314_v36 }
 0x6c4   :  { %v709_v46 = vmul.f32 %v2234_v44, %v2230_v34  ;;  %2085 = vmatprep.subr.mxu0 %v2314_v36 }
 0x6c6   :  { %2073 = vmatmul.mubr.msk.f32.vlgmr.msra.gmra.mrb[10].mxu1 %vm202_vm2, %v709_v46  ;;  %2078 = vmatmul.mubr.msk.f32.vlgmr.msra.gmra.mrb[6].mxu0 %vm202_vm2, %v863_v47 }
 0x6c7   :  { %2081 = vmatpush3.xpose.msk.msra.mxu1 %vm202_vm2, %v943_v45  ;;  %2082 = vmatprep.mubr.msk.f32.mxu1 %vm2315_vm1, %v2314_v36 }
 0x6c8   :  { %2090 = vmatprep.subr.mxu1 %v2314_v36  ;;  %2087 = vmatprep.mubr.msk.f32.mxu0 %vm2315_vm1, %v2314_v36 }
 0x6ca   :  { %2083 = vmatmul.mubr.msk.f32.vlgmr.msra.gmra.mrb[12].mxu1 %vm202_vm2, %v941_v48 }
 0x6cb   :  { %2092 = vmatprep.mubr.msk.f32.mxu1 %vm2315_vm1, %v2314_v36 }
 0x795   :  { %v2534_v49 = vpop.f32.mrb[4].mxu0 }
 0x796   :  { %v2069_v50 = vpop.f32.mrb[5].mxu0 }
 0x799   :  { %v2536_v51 = vpop.f32.mrb[10].mxu1  ;;  %v936_v52 = vpop.f32.mrb[6].mxu0 }
 0x79a   :  { %v1018_v53 = vmul.f32 0.35355338, %v936_v52  ;;  %v2074_v54 = vpop.f32.mrb[11].mxu1  ;;  %v2079_v55 = vpop.f32.mrb[7].mxu0 }
 0x79b   :  { %v1558_v54 = vld [vmem:[%s2687_s5] sm:$0xff] }
 0x79c   :  { %v1020_v56 = vsel %vm202_vm2, %v1018_v53, -inf }
 0x79d   :  { %1021 = vmax.xlane.f32.xlu0 %v1020_v56  ;;  %v1014_v57 = vpop.f32.mrb[12].mxu1  ;;  %v1560_v56 = vld [vmem:[%s2687_s5 + $0x10] sm:$0xff] }
 0x79e   :  { %v1019_v58 = vmul.f32 0.35355338, %v1014_v57  ;;  %v2084_v59 = vpop.f32.mrb[13].mxu1  ;;  %v1561_v57 = vld [vmem:[%s2687_s5 + $0x18] sm:$0xff] }
 0x7a0   :  { %v1023_v60 = vsel %vm202_vm2, %v1019_v58, -inf }
 0x7a1   :  { %1024 = vmax.xlane.f32.xlu1 %v1023_v60 }
 0x7b2   :  { %1118 = vrot.lane.b32.xlu1 %v2456_v39, %s2323_s22 }
 0x7b3   :  { %1042 = vrot.lane.b32.xlu0 %v2458_v41, %s2323_s22  ;;  %s1910_s22 = sshll.u32 %s2329_s0, 4  ;;  %s1911_s22 = int_to_ptr.vmem [resolvable:$true] %s1910_s22 }
 0x7b4   :  { %p2290_p9 = scmp.lt.s32.totalorder %s1911_s22, %s1911_s22 }
 0x7b6   :  { %1196 = vrot.lane.b32.xlu1 %v2458_v41, %s2324_s23 }
 0x7ba   :  { %1274 = vrot.lane.b32.xlu1 %v2456_v39, %s2324_s23  ;;  %s2285_s23 = scalar_lea.vmem %s1911_s22, 256 }
 0x7bb   :  { %p2286_p8 = scmp.ne.s32.totalorder %s1911_s22, %s2285_s23  ;;  %p2291_p10 = scmp.lt.s32.totalorder %s2285_s23, %s2285_s23 }
 0x7bd   :  { %p2292_p11 = por %p2291_p10, %p2290_p9 }
 0x7be   :  { %1272 = vrot.lane.b32.xlu1 %v2456_v39, %s2325_s24 }
 0x7bf   :  { %p2293_p12 = pnand %p2292_p11, %p2286_p8 }
 0x82a   :  { %v1022_v61 = vpop.xlane.xlu0 %1021 }
 0x82b   :  { %v1026_v62 = vsub.f32 %v1018_v53, %v1022_v61 }
 0x82d   :  { %v1028_v63 = vmul.f32 1.442695, %v1026_v62 }
 0x82e   :  { %v1043_v2 = vpop.permute.xlu0 %1042  ;;  %v1025_v3 = vpop.xlane.xlu1 %1024 }
 0x82f   :  { %2235 = vpow2.f32 %v1028_v63  ;;  %v1027_v4 = vsub.f32 %v1019_v58, %v1025_v3  ;;  %2086 = vmatpush3.msra.mxu0 %v1043_v2  ;;  %v2168_v58 = vpack.c.bf16 %v1561_v57, %v1560_v56  ;;  %v1807_v56 = vld [vmem:[%s2693_s11 + $0x18] sm:$0xff] }
 0x830   :  { %2095 = vmatprep.subr.mxu0 %v2314_v36 }
 0x831   :  { %v1030_v5 = vmul.f32 1.442695, %v1027_v4 }
 0x832   :  { %v1119_v6 = vpop.permute.xlu1 %1118 }
 0x833   :  { %2237 = vpow2.f32 %v1030_v5  ;;  %2091 = vmatpush3.msra.mxu1 %v1119_v6 }
 0x834   :  { %2100 = vmatprep.subr.mxu1 %v2314_v36 }
 0x836   :  { %v1197_v15 = vpop.permute.xlu1 %1196 }
 0x839   :  { %v2236_v7 = vpop.eup %2235 }
 0x83a   :  { %v1032_v8 = vsel %vm202_vm2, %v2236_v7, 0.0  ;;  %v1275_v19 = vpop.permute.xlu1 %1274 }
 0x83b   :  { %1033 = vadd.xlane.f32.xlu0 %v1032_v8 }
 0x83d   :  { %v2238_v9 = vpop.eup %2237 }
 0x83e   :  { %v1035_v10 = vsel %vm202_vm2, %v2238_v9, 0.0  ;;  %v1273_v22 = vpop.permute.xlu1 %1272 }
 0x83f   :  { %1036 = vadd.xlane.f32.xlu0 %v1035_v10 }
 0x855   :  { %1194 = vrot.lane.b32.xlu0 %v2458_v41, %s2325_s24 }
 0x8c8   :  { %v1034_v11 = vpop.xlane.xlu0 %1033 }
 0x8c9   :  { %2239 = vrcp.f32 %v1034_v11 }
 0x8cc   :  { %v1037_v13 = vpop.xlane.xlu0 %1036 }
 0x8cd   :  { %2241 = vrcp.f32 %v1037_v13 }
 0x8d0   :  { %v1195_v21 = vpop.permute.xlu0 %1194 }
 0x8d3   :  { %v2240_v16 = vpop.eup %2239 }
 0x8d4   :  { %v1040_v17 = vmul.f32 %v2240_v16, %v2236_v7 }
 0x8d6   :  { %2088 = vmatmul.mubr.msk.f32.vlgmr.msra.gmra.mrb[8].mxu0 %vm202_vm2, %v1040_v17 }
 0x8d7   :  { %v2242_v18 = vpop.eup %2241  ;;  %2096 = vmatpush3.xpose.msk.msra.mxu0 %vm202_vm2, %v1197_v15  ;;  %2097 = vmatprep.mubr.msk.f32.mxu0 %vm2315_vm1, %v2314_v36  ;;  %v1951_v15 = vld [vmem:[%s2688_s6] ss:$0 sm:$0xff] }
 0x8d8   :  { %v1041_v20 = vmul.f32 %v2242_v18, %v2238_v9  ;;  %2105 = vmatprep.subr.mxu0 %v2314_v36 }
 0x8da   :  { %2093 = vmatmul.mubr.msk.f32.vlgmr.msra.gmra.mrb[14].mxu1 %vm202_vm2, %v1041_v20  ;;  %2098 = vmatmul.mubr.msk.f32.vlgmr.msra.gmra.mrb[10].mxu0 %vm202_vm2, %v1195_v21 }
 0x8db   :  { %2101 = vmatpush3.xpose.msk.msra.mxu1 %vm202_vm2, %v1275_v19  ;;  %2102 = vmatprep.mubr.msk.f32.mxu1 %vm2315_vm1, %v2314_v36 }
 0x8dc   :  { %2110 = vmatprep.subr.mxu1 %v2314_v36  ;;  %2107 = vmatprep.mubr.msk.f32.mxu0 %vm2315_vm1, %v2314_v36 }
 0x8de   :  { %2103 = vmatmul.mubr.msk.f32.vlgmr.msra.gmra.mrb[16].mxu1 %vm202_vm2, %v1273_v22 }
 0x8df   :  { %2112 = vmatprep.mubr.msk.f32.mxu1 %vm2315_vm1, %v2314_v36 }
 0x9a9   :  { %v1114_v23 = vpop.f32.mrb[8].mxu0 }
 0x9aa   :  { %v2089_v24 = vpop.f32.mrb[9].mxu0 }
 0x9ad   :  { %v1190_v25 = vpop.f32.mrb[14].mxu1  ;;  %v1268_v26 = vpop.f32.mrb[10].mxu0 }
 0x9ae   :  { %v1350_v27 = vmul.f32 0.35355338, %v1268_v26  ;;  %v2094_v28 = vpop.f32.mrb[15].mxu1  ;;  %v2099_v29 = vpop.f32.mrb[11].mxu0 }
 0x9b0   :  { %v1352_v30 = vsel %vm202_vm2, %v1350_v27, -inf }
 0x9b1   :  { %1353 = vmax.xlane.f32.xlu0 %v1352_v30  ;;  %v1346_v31 = vpop.f32.mrb[16].mxu1  ;;  %v1696_v30 = vld [vmem:[%s2691_s9] sm:$0xff] }
 0x9b2   :  { %v1351_v32 = vmul.f32 0.35355338, %v1346_v31  ;;  %v2104_v33 = vpop.f32.mrb[17].mxu1  ;;  %v1697_v31 = vld [vmem:[%s2691_s9 + $0x8] sm:$0xff] }
 0x9b3   :  { %v1698_v33 = vld [vmem:[%s2691_s9 + $0x10] sm:$0xff] }
 0x9b4   :  { %v1355_v34 = vsel %vm202_vm2, %v1351_v32, -inf }
 0x9b5   :  { %1356 = vmax.xlane.f32.xlu1 %v1355_v34  ;;  %v1699_v34 = vld [vmem:[%s2691_s9 + $0x18] sm:$0xff] }
 0x9c6   :  { %1450 = vrot.lane.b32.xlu1 %v2456_v39, %s2326_s25 }
 0x9ca   :  { %1528 = vrot.lane.b32.xlu1 %v2534_v49, %s2313_s19 }
 0x9ce   :  { %1530 = vrot.lane.b32.xlu1 %v2536_v51, %s2313_s19 }
 0x9d2   :  { %1538 = vrot.lane.b32.xlu1 %v1190_v25, %s2327_s26 }
 0xa3e   :  { %v1354_v36 = vpop.xlane.xlu0 %1353 }
 0xa3f   :  { %v1358_v35 = vsub.f32 %v1350_v27, %v1354_v36  ;;  %v2176_v36 = vpack.c.bf16 %v1699_v34, %v1698_v33 }
 0xa41   :  { %v1360_v37 = vmul.f32 1.442695, %v1358_v35 }
 0xa42   :  { %v1357_v38 = vpop.xlane.xlu1 %1356 }
 0xa43   :  { %2243 = vpow2.f32 %v1360_v37  ;;  %v1359_v40 = vsub.f32 %v1351_v32, %v1357_v38  ;;  %v2172_v32 = vpack.c.bf16 %v1697_v31, %v1696_v30 }
 0xa45   :  { %v1362_v42 = vmul.f32 1.442695, %v1359_v40 }
 0xa46   :  { %v1451_v43 = vpop.permute.xlu1 %1450 }
 0xa47   :  { %2245 = vpow2.f32 %v1362_v42  ;;  %2111 = vmatpush3.msra.mxu1 %v1451_v43 }
 0xa48   :  { %2173 = vmatprep.subr.bf16.mxu1 %v2172_v32 }
 0xa4a   :  { %v1529_v63 = vpop.permute.xlu1 %1528 }
 0xa4b   :  { %v1550_v4 = vsel %vm202_vm2, %v2502_v12, %v1529_v63 }
 0xa4d   :  { %v2244_v44 = vpop.eup %2243 }
 0xa4e   :  { %v1364_v39 = vsel %vm202_vm2, %v2244_v44, 0.0  ;;  %v1531_v2 = vpop.permute.xlu1 %1530 }
 0xa4f   :  { %1365 = vadd.xlane.f32.xlu0 %v1364_v39  ;;  %v1551_v9 = vsel %vm202_vm2, %v2504_v14, %v1531_v2  ;;  %v1954_v39 = vld [vmem:[%s2689_s7] ss:$0 sm:$0xff] }
 0xa50   :  { %v1956_v2 = vld [vmem:[%s2692_s10] ss:$0 sm:$0xff] }
 0xa51   :  { %v2246_v45 = vpop.eup %2245 }
 0xa52   :  { %v1367_v46 = vsel %vm202_vm2, %v2246_v45, 0.0  ;;  %v1539_v5 = vpop.permute.xlu1 %1538 }
 0xa53   :  { %1368 = vadd.xlane.f32.xlu0 %v1367_v46  ;;  %v1554_v10 = vsel %vm1552_vm4, %v1551_v9, %v1539_v5  ;;  %v1955_v46 = vld [vmem:[%s2690_s8] ss:$0 sm:$0xff] }
 0xa69   :  { %1374 = vrot.lane.b32.xlu0 %v2458_v41, %s2326_s25  ;;  %v1559_v41 = vld [vmem:[%s2687_s5 + $0x8] sm:$0xff] }
 0xa6a   :  { %v2164_v55 = vpack.c.bf16 %v1559_v41, %v1558_v54  ;;  %v1805_v54 = vld [vmem:[%s2693_s11 + $0x8] sm:$0xff] }
 0xa6d   :  { %1536 = vrot.lane.b32.xlu0 %v1114_v23, %s2327_s26 }
 0xadc   :  { %v1366_v47 = vpop.xlane.xlu0 %1365 }
 0xadd   :  { %2247 = vrcp.f32 %v1366_v47 }
 0xae0   :  { %v1369_v48 = vpop.xlane.xlu0 %1368 }
 0xae1   :  { %2249 = vrcp.f32 %v1369_v48 }
 0xae4   :  { %v1375_v49 = vpop.permute.xlu0 %1374 }
 0xae5   :  { %2106 = vmatpush3.msra.mxu0 %v1375_v49 }
 0xae6   :  { %2165 = vmatprep.subr.bf16.mxu0 %v2164_v55 }
 0xae7   :  { %v2248_v50 = vpop.eup %2247 }
 0xae8   :  { %v1372_v51 = vmul.f32 %v2248_v50, %v2244_v44  ;;  %v1537_v3 = vpop.permute.xlu0 %1536 }
 0xae9   :  { %v1553_v6 = vsel %vm1552_vm4, %v1550_v4, %v1537_v3 }
 0xaea   :  { %2108 = vmatmul.mubr.msk.f32.vlgmr.msra.gmra.mrb[12].mxu0 %vm202_vm2, %v1372_v51 }
 0xaeb   :  { %v2250_v52 = vpop.eup %2249  ;;  %2167 = vmatpush3.bf16.msra.mxu0 %v2164_v55  ;;  %v1806_v55 = vld [vmem:[%s2693_s11 + $0x10] sm:$0xff] }
 0xaec   :  { %v1373_v53 = vmul.f32 %v2250_v52, %v2246_v45  ;;  %2169 = vmatprep.subr.bf16.mxu0 %v2168_v58  ;;  %v2184_v57 = vpack.c.bf16 %v1807_v56, %v1806_v55 }
 0xaee   :  { %2113 = vmatmul.mubr.msk.f32.vlgmr.msra.gmra.mrb[18].mxu1 %vm202_vm2, %v1373_v53  ;;  %v1804_v53 = vld [vmem:[%s2693_s11] sm:$0xff] }
 0xaef   :  { %2171 = vmatpush3.bf16.msra.mxu0 %v2168_v58  ;;  %2175 = vmatpush3.bf16.msra.mxu1 %v2172_v32  ;;  %v2180_v41 = vpack.c.bf16 %v1805_v54, %v1804_v53  ;;  %v1808_v58 = vld [vmem:[%s2693_s11 + $0x20] sm:$0xff] }
 0xaf0   :  { %2177 = vmatprep.subr.bf16.mxu1 %v2176_v36 }
 0xaf1   :  { %2181 = vmatprep.subr.bf16.mxu0 %v2180_v41 }
 0xaf3   :  { %2179 = vmatpush3.bf16.msra.mxu1 %v2176_v36 }
 0xbbd   :  { %v1446_v59 = vpop.f32.mrb[12].mxu0 }
 0xbbe   :  { %1544 = vrot.lane.b32.xlu0 %v1446_v59, %s2328_s15  ;;  %v2109_v60 = vpop.f32.mrb[13].mxu0  ;;  %v1809_v59 = vld [vmem:[%s2693_s11 + $0x28] sm:$0xff] }
 0xbbf   :  { %v2188_v60 = vpack.c.bf16 %v1809_v59, %v1808_v58 }
 0xbc1   :  { %v1522_v61 = vpop.f32.mrb[18].mxu1 }
 0xbc2   :  { %1546 = vrot.lane.b32.xlu1 %v1522_v61, %s2328_s15  ;;  %v2114_v62 = vpop.f32.mrb[19].mxu1  ;;  %v1810_v61 = vld [vmem:[%s2693_s11 + $0x30] sm:$0xff] }
 0xbc3   :  { %v1811_v62 = vld [vmem:[%s2693_s11 + $0x38] sm:$0xff] }
 0xbc4   :  { %v2192_v63 = vpack.c.bf16 %v1811_v62, %v1810_v61 }
 0xc30   :  { %v1545_v7 = vpop.permute.xlu0 %1544 }
 0xc31   :  { %v1556_v8 = vsel %vm1555_vm3, %v1553_v6, %v1545_v7 }
 0xc32   :  { %2123 = vmatprep.mubr.msk.f32.mxu0 %vm61_vm0, %v1556_v8 }
 0xc34   :  { %v1547_v11 = vpop.permute.xlu1 %1546 }
 0xc35   :  { %v1557_v13 = vsel %vm1555_vm3, %v1554_v10, %v1547_v11 }
 0xc36   :  { %2124 = vmatmul.mubr.msk.f32.vlgmr.msra.gmra.mrb[14].mxu0 %vm61_vm0, %v1557_v13 }
 0xc37   :  { %2183 = vmatpush3.bf16.msra.mxu0 %v2180_v41 }
 0xc38   :  { %2185 = vmatprep.subr.bf16.mxu0 %v2184_v57 }
 0xc3b   :  { %2187 = vmatpush3.bf16.msra.mxu0 %v2184_v57 }
 0xc3c   :  { %2189 = vmatprep.subr.bf16.mxu0 %v2188_v60 }
 0xc3f   :  { %2191 = vmatpush3.bf16.msra.mxu0 %v2188_v60 }
 0xc40   :  { %2193 = vmatprep.subr.bf16.mxu0 %v2192_v63 }
 0xc43   :  { %2195 = vmatpush3.bf16.msra.mxu0 %v2192_v63 }
 0xd09   :  { %v2125_v12 = vpop.f32.mrb[14].mxu0 }
 0xd0a   :  { %v1647_v16 = vadd.f32 %v2125_v12, %v1951_v15  ;;  %v1641_v17 = vpop.f32.mrb[15].mxu0 }
 0xd0b   :  { %v1642_v18 = vadd.f32 %v1951_v15, %v1641_v17 }
 0xd0c   :  { %v2600_v19 = vadd.f32 %v1647_v16, %v2417_v1 }
 0xd0d   :  { %v2603_v20 = vadd.f32 %v1642_v18, %v2415_v0 }
 0xd0e   :  { %v1655_v14 = vsel %vm61_vm0, %v2600_v19, 0.0 }
 0xd0f   :  { %1656 = vadd.xlane.f32.xlu1 %v1655_v14  ;;  %v1652_v21 = vsel %vm61_vm0, %v2603_v20, 0.0 }
 0xd10   :  { %1653 = vadd.xlane.f32.xlu0 %v1652_v21  ;;  %v1961_v21 = vld [vmem:[%s2694_s12] ss:$0 sm:$0xff] }
 0xd9c   :  { %v1657_v22 = vpop.xlane.xlu1 %1656 }
 0xd9d   :  { %v1659_v23 = vmul.f32 0.03125, %v1657_v22  ;;  %v1654_v24 = vpop.xlane.xlu0 %1653 }
 0xd9e   :  { %v1658_v25 = vmul.f32 0.03125, %v1654_v24 }
 0xd9f   :  { %v1661_v26 = vsub.f32 %v2600_v19, %v1659_v23 }
 0xda0   :  { %v1660_v1 = vsub.f32 %v2603_v20, %v1658_v25 }
 0xda1   :  { %v1663_v28 = vmul.f32 %v1661_v26, %v1661_v26 }
 0xda2   :  { %v1662_v27 = vmul.f32 %v1660_v1, %v1660_v1 }
 0xda3   :  { %v1667_v29 = vsel %vm61_vm0, %v1663_v28, 0.0 }
 0xda4   :  { %v1664_v0 = vsel %vm61_vm0, %v1662_v27, 0.0 }
 0xda5   :  { %1665 = vadd.xlane.f32.xlu0 %v1664_v0 }
 0xda9   :  { %1668 = vadd.xlane.f32.xlu0 %v1667_v29 }
 0xe32   :  { %v1666_v35 = vpop.xlane.xlu0 %1665 }
 0xe33   :  { %v1670_v37 = vmul.f32 0.03125, %v1666_v35 }
 0xe35   :  { %v1672_v38 = vadd.f32 1e-06, %v1670_v37 }
 0xe36   :  { %v1669_v40 = vpop.xlane.xlu0 %1668 }
 0xe37   :  { %2251 = vrsqrt.f32 %v1672_v38  ;;  %v1671_v42 = vmul.f32 0.03125, %v1669_v40 }
 0xe39   :  { %v1673_v43 = vadd.f32 1e-06, %v1671_v42 }
 0xe3b   :  { %2253 = vrsqrt.f32 %v1673_v43 }
 0xe41   :  { %v2252_v44 = vpop.eup %2251 }
 0xe42   :  { %v1676_v45 = vmul.f32 %v2252_v44, %v1660_v1 }
 0xe44   :  { %v1685_v47 = vmul.f32 %v1954_v39, %v1676_v45 }
 0xe45   :  { %v2254_v48 = vpop.eup %2253 }
 0xe46   :  { %v1677_v49 = vmul.f32 %v2254_v48, %v1661_v26  ;;  %v1694_v50 = vadd.f32 %v1955_v46, %v1685_v47 }
 0xe48   :  { %v1686_v51 = vmul.f32 %v1954_v39, %v1677_v49  ;;  %2134 = vmatprep.mubr.msk.f32.mxu1 %vm61_vm0, %v1694_v50 }
 0xe4a   :  { %v1695_v52 = vadd.f32 %v1955_v46, %v1686_v51 }
 0xe4c   :  { %2135 = vmatmul.mubr.msk.f32.vlgmr.msra.gmra.mrb[20].mxu1 %vm61_vm0, %v1695_v52 }
 0xf1f   :  { %v2136_v3 = vpop.f32.mrb[20].mxu1 }
 0xf20   :  { %v1785_v4 = vadd.f32 %v2136_v3, %v1956_v2  ;;  %v1779_v5 = vpop.f32.mrb[21].mxu1 }
 0xf21   :  { %v1780_v6 = vadd.f32 %v1956_v2, %v1779_v5 }
 0xf22   :  { %v1960_v7 = vmul.f32 -1.702, %v1785_v4 }
 0xf23   :  { %v1959_v8 = vmul.f32 -1.702, %v1780_v6 }
 0xf24   :  { %v1794_v9 = vmul.f32 1.442695, %v1960_v7 }
 0xf25   :  { %v1792_v10 = vmul.f32 1.442695, %v1959_v8 }
 0xf26   :  { %2255 = vpow2.f32 %v1794_v9 }
 0xf27   :  { %2257 = vpow2.f32 %v1792_v10 }
 0xf30   :  { %v2256_v11 = vpop.eup %2255 }
 0xf31   :  { %v2258_v13 = vpop.eup %2257  ;;  %v1797_v15 = vadd.f32 1.0, %v2256_v11 }
 0xf32   :  { %v1796_v12 = vadd.f32 1.0, %v2258_v13 }
 0xf33   :  { %2259 = vrcp.f32 %v1797_v15 }
 0xf34   :  { %2261 = vrcp.f32 %v1796_v12 }
 0xf3d   :  { %v2260_v16 = vpop.eup %2259 }
 0xf3e   :  { %v2262_v17 = vpop.eup %2261  ;;  %v1803_v14 = vmul.f32 %v2260_v16, %v1785_v4 }
 0xf3f   :  { %v1802_v18 = vmul.f32 %v2262_v17, %v1780_v6 }
 0xf41   :  { %2153 = vmatprep.mubr.msk.f32.mxu0 %vm1819_vm5, %v1802_v18 }
 0xf42   :  { %2154 = vmatmul.mubr.msk.f32.vlgmr.msra.gmra.mrb[16].mxu0 %vm1819_vm5, %v1803_v14 }
0x1015   :  { %v2155_v22 = vpop.f32.mrb[16].mxu0 }
0x1016   :  { %v1898_v23 = vadd.f32 %v2155_v22, %v1961_v21  ;;  %v1892_v24 = vpop.f32.mrb[17].mxu0 }
0x1017   :  { %v1893_v25 = vadd.f32 %v1961_v21, %v1892_v24 }
0x1018   :  { %v1902_v26 = vadd.f32 %v1898_v23, %v2600_v19 }
0x1019   :  { %v1901_v1 = vadd.f32 %v1893_v25, %v2603_v20 }
0x101a   :  { %1904 = vst.msk [vmem:[#allocation5 + $0x8] sm:$0xff] %vm61_vm0, %v1902_v26 }
0x101b   :  { %1903 = vst.msk [vmem:[#allocation5] sm:$0xff] %vm61_vm0, %v1901_v1 }
0x101c   :  { %2296 = shalt.err (!%p2293_p12)
}
0x101d   :  { %s2297_s25 = scalar_lea.hbm %s2695_s13, 256 }
0x101e   :  { %p2298_p13 = scmp.ne.s32.totalorder %s2695_s13, %s2297_s25  ;;  %p2301_p0 = scmp.lt.u32.totalorder %s2297_s25, %s2695_s13 }
0x1020   :  { %p2303_p1 = pnand %p2301_p0, %p2298_p13 }
0x1022   :  { %2306 = shalt.err (!%p2303_p1)
}
0x1023   :  { %1916 = dma.vmem_to_hbm [thread:$0]  %s1911_s22, 256, %s2695_s13, [#allocation4], %s2312_s18, %s2312_s18, %s2313_s19  }
0x1024   :  { %2309 = dma.done.wait [#allocation4], 256  }
0x1025   :  { %2310 = vsyncadd [#allocation4], 4294967040 }
0x1026   :  { %1920 = vsyncpa [#allocation3], 1 }
0x1027   :  { %1921 = vsyncpa [#allocation4], 1 }

</bundles_post_ra>
